<compile_context>
chip_gen: v7x
topology: tpu7x:2x2x1
jax: 0.10.0
libtpu: 0.0.40
codegen_flags: <defaults>
</compile_context>

<pallas_src>
import math

import jax
import jax.numpy as jnp
import numpy as np
from jax.experimental import pallas as pl
from jax.experimental.pallas import tpu as pltpu

# ---------------- config (small, consistent with BertSelfAttention) ----------------
BATCH = 2
SEQ = 8
HIDDEN = 32
NUM_HEADS = 4
HEAD_DIM = HIDDEN // NUM_HEADS


# ------------------------------ Pallas kernel ------------------------------
def self_attention_kernel(x_ref, mask_ref, wqkv_ref, bqkv_ref, out_ref):
    """One batch element of BertSelfAttention.

    x_ref:    (S, H)      this batch's tokens (leading batch dim squeezed)
    mask_ref: (1, S)      additive key mask for this batch (0 / -10000)
    wqkv_ref: (H, 3*H)    fused [Wq*scale | Wk | Wv]   (scale folded into Wq)
    bqkv_ref: (1, 3*H)    fused [bq*scale | bk | bv]
    out_ref:  (S, H)      context layer for this batch
    """
    x = x_ref[...]                       # [S, H]
    mask = mask_ref[...]                 # [1, S] -> broadcasts over query rows

    # One fused QKV projection (single wide MXU matmul); scale already folded in.
    qkv = jnp.dot(x, wqkv_ref[...], preferred_element_type=jnp.float32) + bqkv_ref[...]

    ctxs = []
    for h in range(NUM_HEADS):           # static unroll, NUM_HEADS = 4
        q = qkv[:, h * HEAD_DIM:(h + 1) * HEAD_DIM]                           # [S, HD]
        k = qkv[:, HIDDEN + h * HEAD_DIM:HIDDEN + (h + 1) * HEAD_DIM]         # [S, HD]
        v = qkv[:, 2 * HIDDEN + h * HEAD_DIM:2 * HIDDEN + (h + 1) * HEAD_DIM]

        # scores[i, j] = <q_i, k_j>  -- contract last dims, no explicit k.T.
        scores = jax.lax.dot_general(
            q, k, (((1,), (1,)), ((), ())), preferred_element_type=jnp.float32)
        scores = scores + mask                                                # [S, S]
        scores = scores - jnp.max(scores, axis=-1, keepdims=True)
        p = jnp.exp(scores)
        denom = jnp.sum(p, axis=-1, keepdims=True)                            # [S, 1]

        # Deferred (flash-style) normalization: scale the small [S, HD] tile.
        ctx = jnp.dot(p, v, preferred_element_type=jnp.float32)               # [S, HD]
        ctxs.append(ctx * pl.reciprocal(denom, approx=False))

    # Single lane-dense store of the merged heads.
    out_ref[...] = jnp.concatenate(ctxs, axis=-1)                             # [S, H]


# ------------------------------ Python wrapper ------------------------------
def fuse_qkv_params(wq, wk, wv, bq, bk, bv):
    """One-time fusion: [Wq*s | Wk | Wv] -> (H, 3H), [bq*s | bk | bv] -> (1, 3H).

    The 1/sqrt(HEAD_DIM) score scale is folded into the query projection.
    """
    scale = 1.0 / math.sqrt(HEAD_DIM)
    wqkv = jnp.concatenate([wq * scale, wk, wv], axis=1)
    bqkv = jnp.concatenate([bq * scale, bk, bv]).reshape(1, -1)
    return wqkv.astype(jnp.float32), bqkv.astype(jnp.float32)


@jax.jit
def bert_self_attention_pallas(x, mask, wqkv, bqkv):
    """x: [B, S, H] f32; mask: [B, 1, S] additive (0 / -10000)."""
    B, S, H = x.shape
    return pl.pallas_call(
        self_attention_kernel,
        out_shape=jax.ShapeDtypeStruct((B, S, H), jnp.float32),
        grid=(B,),
        in_specs=[
            pl.BlockSpec((None, S, H), lambda b: (b, 0, 0)),      # x: per-batch tile
            pl.BlockSpec((None, 1, S), lambda b: (b, 0, 0)),      # mask: per-batch key mask
            pl.BlockSpec((H, 3 * H), lambda b: (0, 0)),           # fused W, resident
            pl.BlockSpec((1, 3 * H), lambda b: (0, 0)),           # fused b, resident
        ],
        out_specs=pl.BlockSpec((None, S, H), lambda b: (b, 0, 0)),
        compiler_params=pltpu.CompilerParams(
            dimension_semantics=("parallel",)),
    )(x, mask, wqkv, bqkv)


# -------------------------- pure-JAX reference ------------------------------
def bert_self_attention_ref(x, mask, wq, wk, wv, bq, bk, bv):
    B, S, H = x.shape

    def split_heads(t):  # [B,S,H] -> [B,NH,S,HD]
        return t.reshape(B, S, NUM_HEADS, HEAD_DIM).transpose(0, 2, 1, 3)

    q = split_heads(x @ wq + bq)
    k = split_heads(x @ wk + bk)
    v = split_heads(x @ wv + bv)

    scores = jnp.einsum("bhqd,bhkd->bhqk", q, k) / math.sqrt(HEAD_DIM)
    scores = scores + mask[:, None, :, :]            # [B,1,1,S] broadcast
    probs = jax.nn.softmax(scores, axis=-1)
    ctx = jnp.einsum("bhqk,bhkd->bhqd", probs, v)
    return ctx.transpose(0, 2, 1, 3).reshape(B, S, H)


# ------------------------------------ main ----------------------------------
if __name__ == "__main__":
    key = jax.random.PRNGKey(0)
    ks = jax.random.split(key, 7)

    def w(k, shape, scale=0.05):
        return (scale * jax.random.normal(k, shape)).astype(jnp.float32)

    wq = w(ks[0], (HIDDEN, HIDDEN))     # (in, out) layout
    wk = w(ks[1], (HIDDEN, HIDDEN))
    wv = w(ks[2], (HIDDEN, HIDDEN))
    bq = w(ks[3], (HIDDEN,))
    bk = w(ks[4], (HIDDEN,))
    bv = w(ks[5], (HIDDEN,))
    x = w(ks[6], (BATCH, SEQ, HIDDEN), scale=1.0)

    # additive attention mask [B, 1, S]: 0 = attend, -10000 = masked
    valid = jnp.array([[1.0] * SEQ, [1.0] * (SEQ - 2) + [0.0] * 2], jnp.float32)
    mask = ((1.0 - valid) * -10000.0).reshape(BATCH, 1, SEQ)

    # Weight fusion (incl. score scale) done once, outside the per-call path.
    wqkv, bqkv = fuse_qkv_params(wq, wk, wv, bq, bk, bv)

    out = bert_self_attention_pallas(x, mask, wqkv, bqkv)
    out = jax.block_until_ready(out)

    ref = bert_self_attention_ref(x, mask, wq, wk, wv, bq, bk, bv)
    np.testing.assert_allclose(np.asarray(out), np.asarray(ref), rtol=1e-5, atol=1e-5)

    print("KERNEL_OK")
</pallas_src>

<mosaic_0001>
module attributes {stable_mosaic.version = 11 : i64} {
  func.func @self_attention_kernel(%arg0: i32, %arg1: memref<1x8x32xf32, #tpu.memory_space<vmem>>, %arg2: memref<1x1x8xf32, #tpu.memory_space<vmem>>, %arg3: memref<32x96xf32, #tpu.memory_space<vmem>>, %arg4: memref<1x96xf32, #tpu.memory_space<vmem>>, %arg5: memref<1x8x32xf32, #tpu.memory_space<vmem>>) attributes {dimension_semantics = [#tpu.dimension_semantics<parallel>], iteration_bounds = array<i64: 2>, scalar_prefetch = 0 : i64, scratch_operands = 0 : i64, tpu.core_type = #tpu.core_type<tc>, window_params = [{transform_indices = @transform_0, window_bounds = array<i64: 1, 8, 32>}, {transform_indices = @transform_1, window_bounds = array<i64: 1, 1, 8>}, {pipeline_mode = #tpu.pipeline_mode<synchronous>, transform_indices = @transform_2, window_bounds = array<i64: 32, 96>}, {pipeline_mode = #tpu.pipeline_mode<synchronous>, transform_indices = @transform_3, window_bounds = array<i64: 1, 96>}, {transform_indices = @transform_4, window_bounds = array<i64: 1, 8, 32>}]} {
    %c0 = arith.constant 0 : index
    %c0_0 = arith.constant 0 : index
    %c0_1 = arith.constant 0 : index
    %0 = vector.load %arg1[%c0, %c0_0, %c0_1] : memref<1x8x32xf32, #tpu.memory_space<vmem>>, vector<1x8x32xf32>
    %1 = vector.shape_cast %0 : vector<1x8x32xf32> to vector<8x32xf32>
    %c0_2 = arith.constant 0 : index
    %c0_3 = arith.constant 0 : index
    %c0_4 = arith.constant 0 : index
    %2 = vector.load %arg2[%c0_2, %c0_3, %c0_4] : memref<1x1x8xf32, #tpu.memory_space<vmem>>, vector<1x1x8xf32>
    %3 = vector.shape_cast %2 : vector<1x1x8xf32> to vector<1x8xf32>
    %c0_5 = arith.constant 0 : index
    %c0_6 = arith.constant 0 : index
    %4 = vector.load %arg3[%c0_5, %c0_6] : memref<32x96xf32, #tpu.memory_space<vmem>>, vector<32x96xf32>
    %cst = arith.constant dense<0.000000e+00> : vector<8x96xf32>
    %5 = tpu.matmul %1, %4, %cst {dimension_numbers = #tpu.dot_dimension_numbers<[1], [0], [0], [1], [0, 0, 1, 1], [], []>} : vector<8x32xf32>, vector<32x96xf32>, vector<8x96xf32> -> vector<8x96xf32>
    %c0_7 = arith.constant 0 : index
    %c0_8 = arith.constant 0 : index
    %6 = vector.load %arg4[%c0_7, %c0_8] : memref<1x96xf32, #tpu.memory_space<vmem>>, vector<1x96xf32>
    %7 = vector.broadcast %6 : vector<1x96xf32> to vector<8x96xf32>
    %8 = arith.addf %5, %7 : vector<8x96xf32>
    %9 = vector.extract_strided_slice %8 {offsets = [0, 0], sizes = [8, 8], strides = [1, 1]} : vector<8x96xf32> to vector<8x8xf32>
    %10 = vector.extract_strided_slice %8 {offsets = [0, 32], sizes = [8, 8], strides = [1, 1]} : vector<8x96xf32> to vector<8x8xf32>
    %11 = vector.extract_strided_slice %8 {offsets = [0, 64], sizes = [8, 8], strides = [1, 1]} : vector<8x96xf32> to vector<8x8xf32>
    %cst_9 = arith.constant dense<0.000000e+00> : vector<8x8xf32>
    %12 = tpu.matmul %9, %10, %cst_9 {dimension_numbers = #tpu.dot_dimension_numbers<[1], [1], [0], [0], [0, 0, 1, 0], [], []>} : vector<8x8xf32>, vector<8x8xf32>, vector<8x8xf32> -> vector<8x8xf32>
    %13 = vector.broadcast %3 : vector<1x8xf32> to vector<8x8xf32>
    %14 = arith.addf %12, %13 : vector<8x8xf32>
    %cst_10 = arith.constant dense<0xFF800000> : vector<8xf32>
    %15 = vector.multi_reduction <maximumf>, %14, %cst_10 [1] : vector<8x8xf32> to vector<8xf32>
    %16 = vector.shape_cast %15 : vector<8xf32> to vector<8x1xf32>
    %17 = vector.broadcast %16 : vector<8x1xf32> to vector<8x8xf32>
    %18 = arith.subf %14, %17 : vector<8x8xf32>
    %19 = math.exp %18 : vector<8x8xf32>
    %cst_11 = arith.constant dense<0.000000e+00> : vector<8xf32>
    %20 = vector.multi_reduction <add>, %19, %cst_11 [1] : vector<8x8xf32> to vector<8xf32>
    %21 = vector.shape_cast %20 : vector<8xf32> to vector<8x1xf32>
    %cst_12 = arith.constant dense<0.000000e+00> : vector<8x8xf32>
    %22 = tpu.matmul %19, %11, %cst_12 {dimension_numbers = #tpu.dot_dimension_numbers<[1], [0], [0], [1], [0, 0, 1, 1], [], []>} : vector<8x8xf32>, vector<8x8xf32>, vector<8x8xf32> -> vector<8x8xf32>
    %23 = tpu.reciprocal %21 : vector<8x1xf32> -> vector<8x1xf32>
    %24 = vector.broadcast %23 : vector<8x1xf32> to vector<8x8xf32>
    %25 = arith.mulf %22, %24 : vector<8x8xf32>
    %26 = vector.extract_strided_slice %8 {offsets = [0, 8], sizes = [8, 8], strides = [1, 1]} : vector<8x96xf32> to vector<8x8xf32>
    %27 = vector.extract_strided_slice %8 {offsets = [0, 40], sizes = [8, 8], strides = [1, 1]} : vector<8x96xf32> to vector<8x8xf32>
    %28 = vector.extract_strided_slice %8 {offsets = [0, 72], sizes = [8, 8], strides = [1, 1]} : vector<8x96xf32> to vector<8x8xf32>
    %cst_13 = arith.constant dense<0.000000e+00> : vector<8x8xf32>
    %29 = tpu.matmul %26, %27, %cst_13 {dimension_numbers = #tpu.dot_dimension_numbers<[1], [1], [0], [0], [0, 0, 1, 0], [], []>} : vector<8x8xf32>, vector<8x8xf32>, vector<8x8xf32> -> vector<8x8xf32>
    %30 = vector.broadcast %3 : vector<1x8xf32> to vector<8x8xf32>
    %31 = arith.addf %29, %30 : vector<8x8xf32>
    %cst_14 = arith.constant dense<0xFF800000> : vector<8xf32>
    %32 = vector.multi_reduction <maximumf>, %31, %cst_14 [1] : vector<8x8xf32> to vector<8xf32>
    %33 = vector.shape_cast %32 : vector<8xf32> to vector<8x1xf32>
    %34 = vector.broadcast %33 : vector<8x1xf32> to vector<8x8xf32>
    %35 = arith.subf %31, %34 : vector<8x8xf32>
    %36 = math.exp %35 : vector<8x8xf32>
    %cst_15 = arith.constant dense<0.000000e+00> : vector<8xf32>
    %37 = vector.multi_reduction <add>, %36, %cst_15 [1] : vector<8x8xf32> to vector<8xf32>
    %38 = vector.shape_cast %37 : vector<8xf32> to vector<8x1xf32>
    %cst_16 = arith.constant dense<0.000000e+00> : vector<8x8xf32>
    %39 = tpu.matmul %36, %28, %cst_16 {dimension_numbers = #tpu.dot_dimension_numbers<[1], [0], [0], [1], [0, 0, 1, 1], [], []>} : vector<8x8xf32>, vector<8x8xf32>, vector<8x8xf32> -> vector<8x8xf32>
    %40 = tpu.reciprocal %38 : vector<8x1xf32> -> vector<8x1xf32>
    %41 = vector.broadcast %40 : vector<8x1xf32> to vector<8x8xf32>
    %42 = arith.mulf %39, %41 : vector<8x8xf32>
    %43 = vector.extract_strided_slice %8 {offsets = [0, 16], sizes = [8, 8], strides = [1, 1]} : vector<8x96xf32> to vector<8x8xf32>
    %44 = vector.extract_strided_slice %8 {offsets = [0, 48], sizes = [8, 8], strides = [1, 1]} : vector<8x96xf32> to vector<8x8xf32>
    %45 = vector.extract_strided_slice %8 {offsets = [0, 80], sizes = [8, 8], strides = [1, 1]} : vector<8x96xf32> to vector<8x8xf32>
    %cst_17 = arith.constant dense<0.000000e+00> : vector<8x8xf32>
    %46 = tpu.matmul %43, %44, %cst_17 {dimension_numbers = #tpu.dot_dimension_numbers<[1], [1], [0], [0], [0, 0, 1, 0], [], []>} : vector<8x8xf32>, vector<8x8xf32>, vector<8x8xf32> -> vector<8x8xf32>
    %47 = vector.broadcast %3 : vector<1x8xf32> to vector<8x8xf32>
    %48 = arith.addf %46, %47 : vector<8x8xf32>
    %cst_18 = arith.constant dense<0xFF800000> : vector<8xf32>
    %49 = vector.multi_reduction <maximumf>, %48, %cst_18 [1] : vector<8x8xf32> to vector<8xf32>
    %50 = vector.shape_cast %49 : vector<8xf32> to vector<8x1xf32>
    %51 = vector.broadcast %50 : vector<8x1xf32> to vector<8x8xf32>
    %52 = arith.subf %48, %51 : vector<8x8xf32>
    %53 = math.exp %52 : vector<8x8xf32>
    %cst_19 = arith.constant dense<0.000000e+00> : vector<8xf32>
    %54 = vector.multi_reduction <add>, %53, %cst_19 [1] : vector<8x8xf32> to vector<8xf32>
    %55 = vector.shape_cast %54 : vector<8xf32> to vector<8x1xf32>
    %cst_20 = arith.constant dense<0.000000e+00> : vector<8x8xf32>
    %56 = tpu.matmul %53, %45, %cst_20 {dimension_numbers = #tpu.dot_dimension_numbers<[1], [0], [0], [1], [0, 0, 1, 1], [], []>} : vector<8x8xf32>, vector<8x8xf32>, vector<8x8xf32> -> vector<8x8xf32>
    %57 = tpu.reciprocal %55 : vector<8x1xf32> -> vector<8x1xf32>
    %58 = vector.broadcast %57 : vector<8x1xf32> to vector<8x8xf32>
    %59 = arith.mulf %56, %58 : vector<8x8xf32>
    %60 = vector.extract_strided_slice %8 {offsets = [0, 24], sizes = [8, 8], strides = [1, 1]} : vector<8x96xf32> to vector<8x8xf32>
    %61 = vector.extract_strided_slice %8 {offsets = [0, 56], sizes = [8, 8], strides = [1, 1]} : vector<8x96xf32> to vector<8x8xf32>
    %62 = vector.extract_strided_slice %8 {offsets = [0, 88], sizes = [8, 8], strides = [1, 1]} : vector<8x96xf32> to vector<8x8xf32>
    %cst_21 = arith.constant dense<0.000000e+00> : vector<8x8xf32>
    %63 = tpu.matmul %60, %61, %cst_21 {dimension_numbers = #tpu.dot_dimension_numbers<[1], [1], [0], [0], [0, 0, 1, 0], [], []>} : vector<8x8xf32>, vector<8x8xf32>, vector<8x8xf32> -> vector<8x8xf32>
    %64 = vector.broadcast %3 : vector<1x8xf32> to vector<8x8xf32>
    %65 = arith.addf %63, %64 : vector<8x8xf32>
    %cst_22 = arith.constant dense<0xFF800000> : vector<8xf32>
    %66 = vector.multi_reduction <maximumf>, %65, %cst_22 [1] : vector<8x8xf32> to vector<8xf32>
    %67 = vector.shape_cast %66 : vector<8xf32> to vector<8x1xf32>
    %68 = vector.broadcast %67 : vector<8x1xf32> to vector<8x8xf32>
    %69 = arith.subf %65, %68 : vector<8x8xf32>
    %70 = math.exp %69 : vector<8x8xf32>
    %cst_23 = arith.constant dense<0.000000e+00> : vector<8xf32>
    %71 = vector.multi_reduction <add>, %70, %cst_23 [1] : vector<8x8xf32> to vector<8xf32>
    %72 = vector.shape_cast %71 : vector<8xf32> to vector<8x1xf32>
    %cst_24 = arith.constant dense<0.000000e+00> : vector<8x8xf32>
    %73 = tpu.matmul %70, %62, %cst_24 {dimension_numbers = #tpu.dot_dimension_numbers<[1], [0], [0], [1], [0, 0, 1, 1], [], []>} : vector<8x8xf32>, vector<8x8xf32>, vector<8x8xf32> -> vector<8x8xf32>
    %74 = tpu.reciprocal %72 : vector<8x1xf32> -> vector<8x1xf32>
    %75 = vector.broadcast %74 : vector<8x1xf32> to vector<8x8xf32>
    %76 = arith.mulf %73, %75 : vector<8x8xf32>
    %77 = tpu.concatenate %25, %42, %59, %76 in 1 : vector<8x8xf32>, vector<8x8xf32>, vector<8x8xf32>, vector<8x8xf32> -> vector<8x32xf32>
    %c0_25 = arith.constant 0 : index
    %c0_26 = arith.constant 0 : index
    %c0_27 = arith.constant 0 : index
    %78 = vector.load %arg5[%c0_25, %c0_26, %c0_27] : memref<1x8x32xf32, #tpu.memory_space<vmem>>, vector<1x8x32xf32>
    %79 = vector.shape_cast %78 : vector<1x8x32xf32> to vector<8x32xf32>
    %80 = vector.shape_cast %77 : vector<8x32xf32> to vector<1x8x32xf32>
    tpu.vector_store %arg5[%c0_25, %c0_26, %c0_27], %80 {strides = array<i32>} : memref<1x8x32xf32, #tpu.memory_space<vmem>>, vector<1x8x32xf32>,
    return
  }
  func.func @transform_0(%arg0: i32) -> (i32, i32, i32) {
    %c0_i32 = arith.constant 0 : i32
    %c0_i32_0 = arith.constant 0 : i32
    %c0_i32_1 = arith.constant 0 : i32
    return %arg0, %c0_i32, %c0_i32_0 : i32, i32, i32
  }
  func.func @transform_1(%arg0: i32) -> (i32, i32, i32) {
    %c0_i32 = arith.constant 0 : i32
    %c0_i32_0 = arith.constant 0 : i32
    %c0_i32_1 = arith.constant 0 : i32
    return %arg0, %c0_i32, %c0_i32_0 : i32, i32, i32
  }
  func.func @transform_2(%arg0: i32) -> (i32, i32) {
    %c0_i32 = arith.constant 0 : i32
    %c0_i32_0 = arith.constant 0 : i32
    %c0_i32_1 = arith.constant 0 : i32
    return %c0_i32, %c0_i32_0 : i32, i32
  }
  func.func @transform_3(%arg0: i32) -> (i32, i32) {
    %c0_i32 = arith.constant 0 : i32
    %c0_i32_0 = arith.constant 0 : i32
    %c0_i32_1 = arith.constant 0 : i32
    return %c0_i32, %c0_i32_0 : i32, i32
  }
  func.func @transform_4(%arg0: i32) -> (i32, i32, i32) {
    %c0_i32 = arith.constant 0 : i32
    %c0_i32_0 = arith.constant 0 : i32
    %c0_i32_1 = arith.constant 0 : i32
    return %arg0, %c0_i32, %c0_i32_0 : i32, i32, i32
  }
}

</mosaic_0001>

<bundles_post_ra>
// kernel: bert_self_attention_pallas.1
= control target key start
LH: loop header
LB: loop body
LE: loop exit
PB: predicated region body
PF: predicated region fallthrough
CT: control target
= control target key end

     0   :  { %9 = vsyncpa [#allocation3], 0  ;;  %s1763_s0 = inlined_call_operand.hbm [shape: f32[2,8,32], index: 0, kind: input, shape index: {}]   ;;  %s1764_s1 = inlined_call_operand.vmem [shape: f32[2,1,8], index: 1, kind: input, shape index: {}]   ;;  %s1765_s2 = inlined_call_operand.hbm [shape: f32[32,96], index: 2, kind: input, shape index: {}]   ;;  %s1766_s3 = inlined_call_operand.vmem [shape: f32[1,96], index: 3, kind: input, shape index: {}]   ;;  %s1767_s4 = inlined_call_operand.hbm [shape: f32[2,8,32], index: 4, kind: output, shape index: {}]  }
   0x1   :  { %11 = vsyncpa [#allocation3 + $0x1], 0 }
   0x2   :  { %12 = vsyncpa [#allocation6], 0 }
   0x3   :  { %13 = vsyncpa [#allocation4], 0 }
   0x4   :  { %15 = vsyncpa [#allocation4 + $0x1], 0  ;;  %s1492_s15 = smov 0   ;;  %s1494_s16 = smov 0  }
   0x5   :  { %s1496_s17 = smov 0   ;;  %s1498_s18 = smov 0  }
   0x6 LB: > { %s1513_s19 = sadd.s32 4294967295, %s1443_s18   ;;  %s1116_s20 = sadd.s32 4294967294, %s1443_s18   ;;  %s1443_s18 = sphi %s1498_s18, %s1787_s18   ;;  %s1439_s17 = sphi %s1496_s17, %s1786_s17   ;;  %s1435_s16 = sphi %s1494_s16, %s1785_s16   ;;  %s1431_s15 = sphi %s1492_s15, %s1784_s15  }
   0x7   : > { %p41_p0 = scmp.ne.s32.totalorder %s1435_s16, %s1431_s15  ;;  %p1768_p1 = scmp.eq.s32.totalorder %s1513_s19, 0 }
   0x8   : > { %p139_p3 = scmp.eq.s32.totalorder %s1116_s20, 1  ;;  %p1117_p5 = scmp.ge.s32.totalorder %s1443_s18, 1 }
   0x9   : > { %p1522_p4 = por %p1768_p1, %p41_p0  ;;  %p146_p7 = scmp.lt.s32.totalorder %s1443_s18, 3 }
   0xa   : > { %p1527_p6 = por %p139_p3, %p41_p0  ;;  %s1445_s24 = smov [#allocation5]  }
   0xb   : > { %s1771_s21 = scalar_select %p1522_p4, 1, 0 }
   0xc   : > { %s1772_s22 = scalar_select %p1527_p6, 1, 0 }
   0xd   : > { %p1532_p8 = pnand %p1117_p5, %p146_p7  ;;  %s158_s25 = sshll.u32 %s1445_s24, 4  ;;  %s1536_s25 = int_to_ptr.vmem [resolvable:$true] %s158_s25 }
   0xe   : > { %s1548_s27 = sadd.s32 1, %s1443_s18   ;;  %s28_s28 = sadd.s32 1, %s1439_s17 }
   0xf   : > { %s1773_s23 = scalar_select %p1532_p8, 1, 0 }
  0x10   : > { %p1231_p9 = pneg %p1532_p8  ;;  %s25_s29 = ssub.s32 %s1443_s18, %s1548_s27 }
  0x11   : > { %s1315_s6 = scalar_lea.hbm %s1765_s2, 512 }
  0x12   : > { %p1543_p11 = pnand %p1231_p9, %p1768_p1  ;;  %p1316_p12 = scmp.ne.s32.totalorder %s1765_s2, %s1315_s6 }
  0x13   : > { %p1322_p5 = scmp.lt.u32.totalorder %s1315_s6, %s1765_s2 }
  0x14   : > { %p1317_p13 = pneg %p1543_p11 }
  0x16   : > { %p1318_p0 = pnand %p1317_p13, %p1316_p12 }
  0x18   : > { %p1319_p3 = pneg %p1318_p0 }
  0x1a   : > { %p1324_p7 = pnand %p1322_p5, %p1319_p3 }
  0x1c   : > { %1327 = shalt.err (!%p1324_p7)
}
  0x1d   : > { %s1328_s11 = scalar_lea.vmem %s1536_s25, 512  ;;  %p1336_p2 = scmp.lt.s32.totalorder %s1536_s25, %s1536_s25 }
  0x1e   : > { %p1329_p9 = scmp.ne.s32.totalorder %s1536_s25, %s1328_s11  ;;  %p1337_p6 = scmp.lt.s32.totalorder %s1328_s11, %s1328_s11 }
  0x20   : > { %p1331_p10 = pnand %p1329_p9, %p1317_p13  ;;  %p1338_p4 = por %p1337_p6, %p1336_p2 }
  0x22   : > { %p1332_p1 = pneg %p1331_p10 }
  0x24   : > { %p1339_p8 = pnand %p1338_p4, %p1332_p1 }
  0x26   : > { %1342 = shalt.err (!%p1339_p8)
}
  0x27   : > { %s1446_s12 = smov 128   ;;  %s1447_s13 = smov 8  }
  0x28   : > { %1234 = dma.hbm_to_vmem [thread:$0]  (!%p1543_p11), %s1765_s2, 512, %s1536_s25, [#allocation6], %s1446_s12, %s1446_s12, %s1447_s13  }
  0x29   : > { %p26_p2 = scmp.eq.s32.totalorder %s25_s29, 0  ;;  %p35_p1 = scmp.ne.s32.totalorder %s1439_s17, %s1435_s16 }
  0x2a   : > { %p36_p4 = scmp.eq.s32.totalorder %s1443_s18, 0  ;;  %p1244_p6 = scmp.lt.s32.totalorder %s1443_s18, 2 }
  0x2b   : > { %s1579_s24 = scalar_select %p26_p2, %s1439_s17, %s28_s28  }
  0x2c   : > { %p37_p8 = por %p36_p4, %p35_p1  ;;  %p1775_p10 = scmp.eq.s32.totalorder %s1513_s19, 1 }
  0x2d   : > { %s175_s5 = sand.u32 1, %s1439_s17   ;;  %s1121_s6 = sshll.u32 %s1443_s18, 7 }
  0x2e   : > { %p1583_p12 = por %p1775_p10, %p35_p1  ;;  %s1120_s7 = sshll.u32 %s175_s5, 3 }
  0x2f   : > { %s1592_s9 = scalar_lea.hbm %s1763_s0, %s1121_s6  ;;  %s179_s25 = scalar_lea.vmem [#allocation2], %s1120_s7 }
  0x30   : > { %s186_s28 = sshll.u32 %s179_s25, 4  ;;  %p1594_p11 = pnand %p1244_p6, %p37_p8  ;;  %s1598_s28 = int_to_ptr.vmem [resolvable:$true] %s186_s28 }
  0x31   : > { %s176_s10 = scalar_lea.sflag [#allocation3], %s175_s5  ;;  %s1343_s11 = scalar_lea.hbm %s1592_s9, 128 }
  0x32   : > { %p1344_p13 = scmp.ne.s32.totalorder %s1592_s9, %s1343_s11  ;;  %p1345_p0 = pneg %p1594_p11 }
  0x33   : > { %s1348_s14 = scalar_lea.hbm %s1763_s0, 256  ;;  %p1349_p7 = scmp.lt.u32.totalorder %s1592_s9, %s1763_s0 }
  0x34   : > { %p1346_p3 = pnand %p1345_p0, %p1344_p13  ;;  %p1350_p9 = scmp.lt.u32.totalorder %s1348_s14, %s1343_s11 }
  0x35   : > { %p1352_p1 = scmp.lt.u32.totalorder %s1343_s11, %s1592_s9 }
  0x36   : > { %p1347_p5 = pneg %p1346_p3  ;;  %p1351_p2 = por %p1350_p9, %p1349_p7 }
  0x38   : > { %p1353_p4 = por %p1352_p1, %p1351_p2 }
  0x3a   : > { %p1354_p6 = pnand %p1353_p4, %p1347_p5 }
  0x3c   : > { %1357 = shalt.err (!%p1354_p6)
}
  0x3d   : > { %s1358_s5 = scalar_lea.vmem %s1598_s28, 128  ;;  %s1448_s7 = smov [#allocation2]  }
  0x3e   : > { %p1359_p8 = scmp.ne.s32.totalorder %s1598_s28, %s1358_s5  ;;  %s1363_s26 = sshll.u32 %s1448_s7, 4  ;;  %s1364_s26 = int_to_ptr.vmem [resolvable:$false] %s1363_s26 }
  0x3f   : > { %s1365_s8 = scalar_lea.vmem %s1364_s26, 256  ;;  %p1366_p3 = scmp.lt.s32.totalorder %s1598_s28, %s1364_s26 }
  0x40   : > { %p1361_p10 = pnand %p1359_p8, %p1345_p0  ;;  %p1367_p7 = scmp.lt.s32.totalorder %s1365_s8, %s1358_s5 }
  0x42   : > { %p1362_p13 = pneg %p1361_p10  ;;  %p1368_p9 = por %p1367_p7, %p1366_p3 }
  0x44   : > { %p1369_p2 = pnand %p1368_p9, %p1362_p13 }
  0x46   : > { %1372 = shalt.err (!%p1369_p2)
}
  0x47   : > { %1238 = dma.hbm_to_vmem [thread:$0]  (!%p1594_p11), %s1592_s9, 128, %s1598_s28, %s176_s10  }
  0x48   : > { %p1778_p5 = scmp.ne.s32.totalorder %s1773_s23, 0 }
  0x49   : > { %s1628_s25 = sand.u32 (!%p1778_p5), 1, %s1435_s16   ;;  %p1779_p0 = scmp.ne.s32.totalorder (!%p1778_p5), %s1771_s21, 0 }
  0x4a   : > { %201 = sbr.rel (%p1778_p5) target bundleno = 1196 (0x4ac), region = 36  ;;  %s1123_s11 = sshll.u32 (!%p1778_p5), %s1628_s25, 3 }
  0x4b   : > { %s204_s12 = scalar_lea.sflag (!%p1778_p5), [#allocation3], %s1628_s25  ;;  %s207_s13 = scalar_lea.vmem (!%p1778_p5), [#allocation2], %s1123_s11 }
  0x51   : > { %1418 = dma.done.wait (%p1779_p0), %s204_s12, 128  }
  0x52   : > { %1420 = vsyncadd (%p1779_p0), %s204_s12, 4294967168  ;;  %p1780_p11 = scmp.eq.s32.totalorder %s1513_s19, 0 }
  0x54   : > { %1422 = dma.done.wait (%p1780_p11), [#allocation6], 512   ;;  %p1781_p1 = pmov %p1780_p11 }
  0x55   : > { %v1449_v0 = vmov 0.0|0.0   ;;  %vm1450_vm0 = vmmov 0   ;;  %v1451_v1 = vmov 0.0   ;;  %v244_v2 = vld [vmem:[#allocation5] sm:$0xff]  ;;  %v245_v3 = vld [vmem:[#allocation5 + $0x8] sm:$0xff]  ;;  %v246_v4 = vld [vmem:[#allocation5 + $0x10] sm:$0xff] }
  0x56   : > { %1424 = vsyncadd (%p1781_p1), [#allocation6], 4294966784  ;;  %1217 = vmatprep.subr.bf16.mxu0 %v1449_v0  ;;  %1174 = vmatprep.mubr.msk.f32.mxu0 %vm1450_vm0, %v1451_v1  ;;  %v1218_v5 = vpack.c.bf16 %v245_v3, %v244_v2  ;;  %v247_v6 = vld [vmem:[#allocation5 + $0x18] sm:$0xff]  ;;  %vm255_vm1 = vcmask 261120   ;;  %v1126_v9 = vld [vmem:[%s1766_s3] ss:$0 sm:$0xff] }
  0x57   : > { %1177 = vmatprep.subr.mxu1 %v1451_v1  ;;  %1179 = vmatprep.mubr.msk.f32.mxu1 %vm1450_vm0, %v1451_v1  ;;  %v1221_v7 = vpack.c.bf16 %v247_v6, %v246_v4  ;;  %v242_v8 = vld [vmem:[%s207_s13] sm:$0xff]  ;;  %s1452_s9 = smov 120   ;;  %s1453_s28 = smov 96   ;;  %vm338_vm2 = vcmask 64512   ;;  %vm1008_vm3 = vcmask 130048   ;;  %vm1010_vm4 = vcmask 195584  }
  0x58   : > { %1219 = vmatpush3.bf16.msra.mxu0 %v1218_v5  ;;  %s1454_s29 = smov 80   ;;  %s1455_s10 = smov 88  }
  0x59   : > { %1220 = vmatprep.subr.bf16.mxu0 %v1449_v0  ;;  %s1456_s14 = smov 72   ;;  %s1457_s20 = smov 112  }
  0x5a   : > { %s1458_s6 = smov 104   ;;  %p239_p4 = scmp.lt.s32.totalorder %s1513_s19, 1 }
  0x5b   : > { %s1459_s12 = smov 56   ;;  %s1460_s13 = smov 64  }
  0x5c   : > { %1222 = vmatpush3.bf16.msra.mxu0 %v1221_v7  ;;  %s240_s5 = scalar_select %p239_p4, %s1513_s19, 1 }
  0x5d   : > { %1187 = vmatprep.subr.mxu0 %v1451_v1  ;;  %s1461_s21 = smov 40   ;;  %s1462_s23 = smov 48  }
  0x5e   : > { %s241_s8 = scalar_lea.vmem %s1764_s1, %s240_s5  ;;  %s1466_s26 = smov [#allocation7]  }
  0x5f   : > { %1175 = vmatmul.mubr.msk.f32.vlgmr.msra.gmra.mrb[0].mxu0 %vm255_vm1, %v242_v8  ;;  %v1128_v20 = vld [vmem:[%s241_s8] ss:$0 sm:$0xff]  ;;  %s1377_s8 = sshll.u32 %s1466_s26, 4  ;;  %s1378_s8 = int_to_ptr.vmem [resolvable:$false] %s1377_s8 }
  0x60   : > { %1189 = vmatprep.mubr.msk.f32.mxu0 %vm1450_vm0, %v1451_v1 }
 0x132   : > { %v325_v10 = vpop.f32.mrb[0].mxu0 }
 0x133   : > { %v1654_v11 = vadd.f32 %v1126_v9, %v325_v10  ;;  %v1176_v12 = vpop.f32.mrb[1].mxu0 }
 0x135   : > { %500 = vrot.lane.b32.xlu1 %v1654_v11, %s1452_s9  ;;  %336 = vrot.lane.b32.xlu0 %v1654_v11, %s1453_s28  ;;  %s1463_s9 = smov 8   ;;  %s1464_s28 = smov 16  }
 0x139   : > { %667 = vrot.lane.b32.xlu1 %v1654_v11, %s1454_s29  ;;  %502 = vrot.lane.b32.xlu0 %v1654_v11, %s1455_s10  ;;  %s1465_s29 = smov 24   ;;  %s1142_s10 = sshll.u32 %s1513_s19, 7 }
 0x13a   : > { %s1718_s7 = scalar_lea.hbm %s1767_s4, %s1142_s10  ;;  %s1014_s19 = scalar_lea.sflag [#allocation4], %s1628_s25 }
 0x13d   : > { %832 = vrot.lane.b32.xlu1 %v1654_v11, %s1456_s14  ;;  %665 = vrot.lane.b32.xlu0 %v1654_v11, %s1457_s20  ;;  %s238_s14 = scalar_lea.vmem [#allocation7], %s1123_s11 }
 0x13e   : > { %s1027_s20 = sshll.u32 %s238_s14, 4  ;;  %s1720_s20 = int_to_ptr.vmem [resolvable:$true] %s1027_s20 }
 0x13f   : > { %s1373_s11 = scalar_lea.vmem %s1720_s20, 128  ;;  %p1380_p13 = scmp.lt.s32.totalorder %s1720_s20, %s1378_s8 }
 0x140   : > { %p1374_p6 = scmp.ne.s32.totalorder %s1720_s20, %s1373_s11 }
 0x141   : > { %830 = vrot.lane.b32.xlu0 %v1654_v11, %s1458_s6 }
 0x142   : > { %p1375_p8 = pnand %p1374_p6, %p1583_p12 }
 0x144   : > { %p1376_p10 = pneg %p1375_p8 }
 0x1a7   : > { %v501_v13 = vpop.permute.xlu1 %500  ;;  %v337_v14 = vpop.permute.xlu0 %336 }
 0x1a8   : > { %1178 = vmatpush3.xpose.msk.msra.mxu1 %vm338_vm2, %v337_v14 }
 0x1a9   : > { %1182 = vmatprep.subr.mxu1 %v1451_v1 }
 0x1ab   : > { %1180 = vmatmul.mubr.msk.f32.vlgmr.msra.gmra.mrb[0].mxu1 %vm338_vm2, %v1654_v11  ;;  %v503_v15 = vpop.permute.xlu0 %502  ;;  %v668_v16 = vpop.permute.xlu1 %667 }
 0x1ac   : > { %1188 = vmatpush3.xpose.msk.msra.mxu0 %vm338_vm2, %v503_v15  ;;  %1184 = vmatprep.mubr.msk.f32.mxu1 %vm1450_vm0, %v1451_v1 }
 0x1ad   : > { %1197 = vmatprep.subr.mxu0 %v1451_v1 }
 0x1af   : > { %1190 = vmatmul.mubr.msk.f32.vlgmr.msra.gmra.mrb[2].mxu0 %vm338_vm2, %v501_v13  ;;  %v666_v17 = vpop.permute.xlu0 %665  ;;  %v833_v18 = vpop.permute.xlu1 %832 }
 0x1b0   : > { %1198 = vmatpush3.xpose.msk.msra.mxu0 %vm338_vm2, %v668_v16  ;;  %1199 = vmatprep.mubr.msk.f32.mxu0 %vm1450_vm0, %v1451_v1 }
 0x1b1   : > { %1207 = vmatprep.subr.mxu0 %v1451_v1 }
 0x1b3   : > { %1200 = vmatmul.mubr.msk.f32.vlgmr.msra.gmra.mrb[4].mxu0 %vm338_vm2, %v666_v17  ;;  %v831_v19 = vpop.permute.xlu0 %830 }
 0x1b4   : > { %1208 = vmatpush3.xpose.msk.msra.mxu0 %vm338_vm2, %v833_v18  ;;  %1209 = vmatprep.mubr.msk.f32.mxu0 %vm1450_vm0, %v1451_v1 }
 0x1b7   : > { %1210 = vmatmul.mubr.msk.f32.vlgmr.msra.gmra.mrb[6].mxu0 %vm338_vm2, %v831_v19 }
 0x27e   : > { %v409_v21 = vpop.f32.mrb[0].mxu1 }
 0x27f   : > { %v410_v22 = vadd.f32 %v1128_v20, %v409_v21  ;;  %v1181_v23 = vpop.f32.mrb[1].mxu1 }
 0x281   : > { %v413_v24 = vsel %vm338_vm2, %v410_v22, -inf }
 0x282   : > { %414 = vmax.xlane.f32.xlu1 %v413_v24  ;;  %v574_v25 = vpop.f32.mrb[2].mxu0 }
 0x283   : > { %v575_v26 = vadd.f32 %v1128_v20, %v574_v25  ;;  %v1191_v27 = vpop.f32.mrb[3].mxu0 }
 0x285   : > { %v578_v28 = vsel %vm338_vm2, %v575_v26, -inf }
 0x286   : > { %579 = vmax.xlane.f32.xlu0 %v578_v28  ;;  %v739_v29 = vpop.f32.mrb[4].mxu0 }
 0x287   : > { %v740_v30 = vadd.f32 %v1128_v20, %v739_v29  ;;  %v1201_v31 = vpop.f32.mrb[5].mxu0 }
 0x289   : > { %v743_v32 = vsel %vm338_vm2, %v740_v30, -inf }
 0x28a   : > { %744 = vmax.xlane.f32.xlu0 %v743_v32  ;;  %v904_v33 = vpop.f32.mrb[6].mxu0 }
 0x28b   : > { %v1211_v34 = vpop.f32.mrb[7].mxu0  ;;  %v905_v35 = vadd.f32 %v1128_v20, %v904_v33 }
 0x28d   : > { %v908_v36 = vsel %vm338_vm2, %v905_v35, -inf }
 0x293   : > { %587 = vrot.lane.b32.xlu1 %v1654_v11, %s1459_s12  ;;  %s1379_s12 = scalar_lea.vmem %s1378_s8, 256 }
 0x294   : > { %p1381_p3 = scmp.lt.s32.totalorder %s1379_s12, %s1373_s11 }
 0x296   : > { %p1382_p7 = por %p1381_p3, %p1380_p13 }
 0x298   : > { %p1383_p9 = pnand %p1382_p7, %p1376_p10 }
 0x2a0   : > { %422 = vrot.lane.b32.xlu0 %v1654_v11, %s1460_s13 }
 0x2a4   : > { %917 = vrot.lane.b32.xlu0 %v1654_v11, %s1461_s21 }
 0x2b7   : > { %909 = vmax.xlane.f32.xlu1 %v908_v36 }
 0x2c8   : > { %752 = vrot.lane.b32.xlu1 %v1654_v11, %s1462_s23 }
 0x30f   : > { %v415_v37 = vpop.xlane.xlu1 %414 }
 0x310   : > { %v416_v38 = vsub.f32 %v410_v22, %v415_v37 }
 0x312   : > { %v417_v39 = vmul.f32 1.442695, %v416_v38 }
 0x313   : > { %v580_v40 = vpop.xlane.xlu0 %579  ;;  %v588_v48 = vpop.permute.xlu1 %587 }
 0x314   : > { %1299 = vpow2.f32 %v417_v39  ;;  %v581_v41 = vsub.f32 %v575_v26, %v580_v40 }
 0x316   : > { %v582_v42 = vmul.f32 1.442695, %v581_v41 }
 0x317   : > { %v745_v43 = vpop.xlane.xlu0 %744 }
 0x318   : > { %1301 = vpow2.f32 %v582_v42  ;;  %v746_v44 = vsub.f32 %v740_v30, %v745_v43 }
 0x31a   : > { %v747_v45 = vmul.f32 1.442695, %v746_v44 }
 0x31b   : > { %v423_v46 = vpop.permute.xlu0 %422 }
 0x31c   : > { %1303 = vpow2.f32 %v747_v45  ;;  %1183 = vmatpush3.msra.mxu1 %v423_v46 }
 0x31d   : > { %1192 = vmatprep.subr.mxu1 %v1451_v1 }
 0x31e   : > { %v1300_v47 = vpop.eup %1299 }
 0x31f   : > { %1185 = vmatmul.mubr.msk.f32.vlgmr.msra.gmra.mrb[2].mxu1 %vm338_vm2, %v1300_v47  ;;  %v419_v53 = vsel %vm338_vm2, %v1300_v47, 0.0  ;;  %v918_v58 = vpop.permute.xlu0 %917 }
 0x320   : > { %1193 = vmatpush3.msra.mxu1 %v588_v48  ;;  %1194 = vmatprep.mubr.msk.f32.mxu1 %vm1450_vm0, %v1451_v1 }
 0x321   : > { %1202 = vmatprep.subr.mxu1 %v1451_v1 }
 0x322   : > { %v1302_v49 = vpop.eup %1301 }
 0x323   : > { %1195 = vmatmul.mubr.msk.f32.vlgmr.msra.gmra.mrb[4].mxu1 %vm338_vm2, %v1302_v49  ;;  %v584_v50 = vsel %vm338_vm2, %v1302_v49, 0.0 }
 0x324   : > { %585 = vadd.xlane.f32.xlu1 %v584_v50  ;;  %1204 = vmatprep.mubr.msk.f32.mxu1 %vm1450_vm0, %v1451_v1 }
 0x326   : > { %v1304_v51 = vpop.eup %1303 }
 0x327   : > { %v749_v52 = vsel %vm338_vm2, %v1304_v51, 0.0 }
 0x328   : > { %750 = vadd.xlane.f32.xlu0 %v749_v52  ;;  %420 = vadd.xlane.f32.xlu1 %v419_v53 }
 0x344   : > { %v910_v54 = vpop.xlane.xlu1 %909 }
 0x345   : > { %v911_v55 = vsub.f32 %v905_v35, %v910_v54 }
 0x347   : > { %v912_v56 = vmul.f32 1.442695, %v911_v55 }
 0x348   : > { %v753_v57 = vpop.permute.xlu1 %752 }
 0x349   : > { %1305 = vpow2.f32 %v912_v56  ;;  %1203 = vmatpush3.msra.mxu1 %v753_v57 }
 0x34a   : > { %1205 = vmatmul.mubr.msk.f32.vlgmr.msra.gmra.mrb[6].mxu1 %vm338_vm2, %v1304_v51  ;;  %1212 = vmatprep.subr.mxu1 %v1451_v1 }
 0x34b   : > { %1213 = vmatpush3.msra.mxu1 %v918_v58  ;;  %1214 = vmatprep.mubr.msk.f32.mxu1 %vm1450_vm0, %v1451_v1 }
 0x353   : > { %v1306_v59 = vpop.eup %1305 }
 0x354   : > { %1215 = vmatmul.mubr.msk.f32.vlgmr.msra.gmra.mrb[8].mxu1 %vm338_vm2, %v1306_v59  ;;  %v914_v60 = vsel %vm338_vm2, %v1306_v59, 0.0 }
 0x355   : > { %915 = vadd.xlane.f32.xlu0 %v914_v60 }
 0x3b1   : > { %v586_v61 = vpop.xlane.xlu1 %585 }
 0x3b2   : > { %1307 = vrcp.f32 %v586_v61 }
 0x3b5   : > { %v751_v5 = vpop.xlane.xlu0 %750  ;;  %v421_v14 = vpop.xlane.xlu1 %420 }
 0x3b6   : > { %1309 = vrcp.f32 %v751_v5 }
 0x3bc   : > { %v1308_v0 = vpop.eup %1307 }
 0x3c0   : > { %v1310_v1 = vpop.eup %1309 }
 0x3e2   : > { %v916_v6 = vpop.xlane.xlu0 %915 }
 0x3e3   : > { %1311 = vrcp.f32 %v916_v6 }
 0x3e4   : > { %1313 = vrcp.f32 %v421_v14 }
 0x3ed   : > { %v1312_v10 = vpop.eup %1311 }
 0x3ee   : > { %v1314_v15 = vpop.eup %1313 }
 0x3f2   : > { %v494_v62 = vpop.f32.mrb[2].mxu1 }
 0x3f3   : > { %v1186_v63 = vpop.f32.mrb[3].mxu1  ;;  %v499_v18 = vmul.f32 %v1314_v15, %v494_v62 }
 0x3f6   : > { %v659_v2 = vpop.f32.mrb[4].mxu1 }
 0x3f7   : > { %v664_v3 = vmul.f32 %v1308_v0, %v659_v2  ;;  %v1196_v4 = vpop.f32.mrb[5].mxu1 }
 0x3f9   : > { %996 = vrot.lane.b32.xlu0 %v664_v3, %s1463_s9 }
 0x41d   : > { %v824_v7 = vpop.f32.mrb[6].mxu1 }
 0x41e   : > { %v829_v8 = vmul.f32 %v1310_v1, %v824_v7  ;;  %v1206_v9 = vpop.f32.mrb[7].mxu1 }
 0x420   : > { %1000 = vrot.lane.b32.xlu1 %v829_v8, %s1464_s28 }
 0x427   : > { %v989_v11 = vpop.f32.mrb[8].mxu1 }
 0x428   : > { %v994_v12 = vmul.f32 %v1312_v10, %v989_v11  ;;  %v1216_v13 = vpop.f32.mrb[9].mxu1 }
 0x42a   : > { %1004 = vrot.lane.b32.xlu1 %v994_v12, %s1465_s29 }
 0x46b   : > { %v997_v16 = vpop.permute.xlu0 %996 }
 0x46c   : > { %v1007_v19 = vsel %vm338_vm2, %v499_v18, %v997_v16 }
 0x492   : > { %v1001_v17 = vpop.permute.xlu1 %1000 }
 0x493   : > { %v1009_v20 = vsel %vm1008_vm3, %v1007_v19, %v1001_v17 }
 0x49c   : > { %v1005_v21 = vpop.permute.xlu1 %1004 }
 0x49d   : > { %v1011_v22 = vsel %vm1010_vm4, %v1009_v20, %v1005_v21 }
 0x49e   : > { %1012 = vst.msk [vmem:[%s238_s14] sm:$0xff] %vm255_vm1, %v1011_v22 }
 0x49f   : > { %1386 = shalt.err (!%p1383_p9)
}
 0x4a0   : > { %s1387_s25 = scalar_lea.hbm %s1718_s7, 128  ;;  %s1391_s23 = scalar_lea.hbm %s1767_s4, 256 }
 0x4a1   : > { %p1388_p2 = scmp.ne.s32.totalorder %s1718_s7, %s1387_s25  ;;  %p1392_p11 = scmp.lt.u32.totalorder %s1718_s7, %s1767_s4 }
 0x4a2   : > { %p1393_p1 = scmp.lt.u32.totalorder %s1391_s23, %s1387_s25  ;;  %p1395_p6 = scmp.lt.u32.totalorder %s1387_s25, %s1718_s7 }
 0x4a3   : > { %p1389_p5 = pnand %p1388_p2, %p1583_p12 }
 0x4a4   : > { %p1394_p4 = por %p1393_p1, %p1392_p11 }
 0x4a5   : > { %p1390_p0 = pneg %p1389_p5 }
 0x4a6   : > { %p1396_p8 = por %p1395_p6, %p1394_p4 }
 0x4a8   : > { %p1397_p10 = pnand %p1396_p8, %p1390_p0 }
 0x4aa   : > { %1400 = shalt.err (!%p1397_p10)
}
 0x4ab   : > { %1229 = dma.vmem_to_hbm [thread:$0]  (%p1583_p12), %s1720_s20, 128, %s1718_s7, %s1014_s19  }
 0x4ac PF: > { %s1039_s29 = sand.u32 1, %s1431_s15   ;;  %p1782_p13 = scmp.ne.s32.totalorder %s1772_s22, 0 }
 0x4ad   : > { %p1783_p3 = scmp.ge.s32.totalorder %s1443_s18, 2  ;;  %s1040_s10 = scalar_lea.sflag [#allocation4], %s1039_s29 }
 0x4af   : > { %p1240_p7 = pnand %p1783_p3, %p1782_p13 }
 0x4b1   : > { %1426 = dma.done.wait (!%p1240_p7), %s1040_s10, 128  }
 0x4b2   : > { %1428 = vsyncadd (!%p1240_p7), %s1040_s10, 4294967168  ;;  %p18_p9 = scmp.ge.s32.totalorder %s1548_s27, 4   ;;  %s1784_s15 = smov %s1435_s16 }
 0x4b3   : > { %s1785_s16 = smov %s1439_s17  ;;  %s1786_s17 = smov %s1579_s24 }
 0x4b4   : > { %s1787_s18 = smov %s1548_s27  ;;  %20 = sbr.rel (!%p18_p9) target bundleno = 6 (0x6), region = 88 }
 0x4bb   :  { %1045 = vsyncpa [#allocation3], 1 }
 0x4bc   :  { %1047 = vsyncpa [#allocation3 + $0x1], 1 }
 0x4bd   :  { %1048 = vsyncpa [#allocation6], 1 }
 0x4be   :  { %1049 = vsyncpa [#allocation4], 1 }
 0x4bf   :  { %1051 = vsyncpa [#allocation4 + $0x1], 1 }

</bundles_post_ra>
